<compile_context>
chip_gen: v7x
topology: tpu7x:2x2x1
jax: 0.10.0
libtpu: 0.0.40
codegen_flags: <defaults>
</compile_context>

<pallas_src>
import math

import jax
import jax.numpy as jnp
from jax.experimental import pallas as pl
from jax.experimental.pallas import tpu as pltpu


def _round_up(x, m):
    return ((x + m - 1) // m) * m


# -----------------------------------------------------------------------------
# Kernel: per batch tile, out = (x @ W1) @ W2 with fp32 MXU accumulation.
#   x_ref : (TB, f*n)        batch tile (f rows packed per lane-dense row)
#   w1_ref: (f*n, f*k*q)     packed block-diagonal first factor   (VMEM-resident)
#   w2_ref: (f*k*q, f*s*l)   packed/permuted second factor        (VMEM-resident)
#   o_ref : (TB, f*s*l)      final layout, written lane-dense
# -----------------------------------------------------------------------------
def _fused_butterfly_kernel(x_ref, w1_ref, w2_ref, o_ref):
    h = jnp.dot(x_ref[...], w1_ref[...], preferred_element_type=jnp.float32)
    out = jnp.dot(h.astype(w2_ref.dtype), w2_ref[...],
                  preferred_element_type=jnp.float32)
    o_ref[...] = out.astype(o_ref.dtype)


def _vmem_budget():
    """Generation-aware VMEM budget for tile sizing + explicit scoped-VMEM limit."""
    cap = 64 << 20                       # conservative fallback == v7x physical VMEM
    try:
        cap = int(pltpu.get_tpu_info().vmem_capacity_bytes)
    except Exception:
        pass
    budget = (cap * 3) // 4              # ~48 MiB on v7x, ~96 MiB on v5e/v6e
    limit = (cap * 85) // 100            # explicit vmem_limit_bytes, with headroom
    return budget, limit


def pack_butterfly_weights(w1_bfly, w2_bfly, x_dtype=jnp.float32):
    """Pack the two block-diagonal butterfly factors into two dense matrices.

    Call ONCE (parameter init / outside the per-step forward) so the packing
    einsums are off the forward critical path.

    Returns (W1, W2, f):
      W1: (f*n, f*k*q)   block-diagonal first factor, blocks pre-transposed
      W2: (f*k*q, f*s*l) second factor with the (k,q)->(r,l)->(l,r) shuffle folded in
      f : lane-density replication factor (f batch rows -> one row of width f*n)
    """
    k, q, p = w1_bfly.shape
    l, s, r = w2_bfly.shape
    n, kq, sl = k * p, k * q, s * l
    assert l * r == kq
    itemsize = jnp.dtype(x_dtype).itemsize
    budget, _ = _vmem_budget()

    # W1[g*p + i, g*q + j] = w1[g, j, i]    (block-diagonal, blocks pre-transposed)
    w1t = jnp.transpose(w1_bfly, (0, 2, 1))                                  # (k, p, q)
    W1 = jnp.einsum('gij,gh->gihj', w1t,
                    jnp.eye(k, dtype=w1t.dtype)).reshape(n, kq)
    # W2[rr*l + ll, ss*l + ll'] = w2[ll, ss, rr] * delta(ll, ll')
    # (folds the (B,k,q)->(B,r,l)->(B,l,r) shuffle into the second factor)
    W2 = jnp.einsum('lsr,lm->rlsm', w2_bfly,
                    jnp.eye(l, dtype=w2_bfly.dtype)).reshape(kq, sl)
    # TODO(synk): for k*p >> MXU K width (128 v5e / 256 v6e,v7x) pack blocks in groups
    #             of ceil(MXU_K/p) with an "arbitrary" grid axis + VMEM accumulator
    #             instead of fully densifying (avoids k-fold MACs once MXU-bound).

    # Lane-density replication: (tb, n) tiles with n < 128 only use n of 128 lanes
    # (masked vst.msk stores, strided DMAs, ~n/128 MXU K/N utilisation).  Replicating
    # the tiny factors f times lets f batch rows be viewed as one lane-dense row via
    # pure-metadata reshapes.  Extra MACs are free while HBM-bound.
    def _need(d):
        return 128 // math.gcd(d, 128)

    f = 1
    if (n % 128) or (sl % 128):
        f = math.lcm(_need(n), _need(sl))
        # cap f so the (f^2-scaled, worst-case double-buffered) resident weights stay
        # well inside the VMEM budget
        while f > 1 and 2 * (f * n * f * kq + f * kq * f * sl) * itemsize > budget // 2:
            f //= 2
    if f > 1:
        W1 = jnp.einsum('ab,fg->fagb', W1,
                        jnp.eye(f, dtype=W1.dtype)).reshape(f * n, f * kq)
        W2 = jnp.einsum('ab,fg->fagb', W2,
                        jnp.eye(f, dtype=W2.dtype)).reshape(f * kq, f * sl)
    return W1, W2, f


def _choose_tile_rows(b_rows, row_in, row_mid, row_out, itemsize, budget, weight_bytes):
    """Rows per batch tile: as large as the VMEM budget allows (amortises the
    ~0.35us per-grid-step pipeline overhead) while keeping >= ~4 grid steps when
    the batch is large enough (v7x two-TC sharding + pipelining)."""
    bytes_per_row = (2 * (row_in + row_out) * itemsize   # double-buffered x / out tiles
                     + row_mid * 4                       # fp32 intermediate
                     + row_mid * itemsize)               # h.astype(...) copy
    avail = max(budget - 2 * weight_bytes, 1 << 20)      # weights counted double-buffered
    rows = max(8, (avail // bytes_per_row) // 8 * 8)
    rows = min(rows, 8192)                                # sanity cap
    rows = min(rows, max(8, _round_up(pl.cdiv(b_rows, 4), 8)))
    # prefer a nearby tile that divides the batch -> avoids a full jnp.pad copy
    if b_rows > rows and b_rows % rows:
        for cand in range(rows, max(rows // 2, 8) - 1, -8):
            if cand >= 8 and b_rows % cand == 0:
                rows = cand
                break
    return rows


def butterfly_blockdiag_forward_packed(x, W1, W2, f):
    """Run the fused kernel with pre-packed factors (pack_butterfly_weights)."""
    B, n = x.shape
    fn, fkq = W1.shape
    fkq2, fsl = W2.shape
    assert fkq == fkq2 and fn == f * n
    itemsize = jnp.dtype(x.dtype).itemsize
    budget, vmem_limit = _vmem_budget()

    # ---- view f batch rows as one lane-dense row (pure metadata when B % f == 0) ----
    b_f = _round_up(B, f)
    if b_f != B:
        # TODO(synk): guard the tail tile with pl.when + a scalar-prefetched row count
        #             instead of padding, to avoid this copy for ragged batches.
        x = jnp.pad(x, ((0, b_f - B), (0, 0)))
    b_rows = b_f // f
    x_packed = x.reshape(b_rows, fn)

    # ---- batch tiling ----
    weight_bytes = (fn * fkq + fkq * fsl) * itemsize
    tb = _choose_tile_rows(b_rows, fn, fkq, fsl, itemsize, budget, weight_bytes)
    b_pad = _round_up(b_rows, tb)
    if b_pad != b_rows:
        x_packed = jnp.pad(x_packed, ((0, b_pad - b_rows), (0, 0)))

    cost = pl.CostEstimate(
        flops=2 * b_pad * (fn * fkq + fkq * fsl),
        transcendentals=0,
        bytes_accessed=(b_pad * (fn + fsl) + fn * fkq + fkq * fsl) * itemsize,
    )

    def run(single_buffer_weights):
        w_kwargs = ({'pipeline_mode': pl.Buffered(1)} if single_buffer_weights else {})
        return pl.pallas_call(
            _fused_butterfly_kernel,
            out_shape=jax.ShapeDtypeStruct((b_pad, fsl), x.dtype),
            grid_spec=pltpu.PrefetchScalarGridSpec(
                num_scalar_prefetch=0,
                grid=(b_pad // tb,),
                in_specs=[
                    pl.BlockSpec((tb, fn), lambda i: (i, 0)),                 # x batch tile
                    pl.BlockSpec((fn, fkq), lambda i: (0, 0), **w_kwargs),    # resident W1
                    pl.BlockSpec((fkq, fsl), lambda i: (0, 0), **w_kwargs),   # resident W2
                ],
                out_specs=pl.BlockSpec((tb, fsl), lambda i: (i, 0)),
            ),
            compiler_params=pltpu.CompilerParams(
                dimension_semantics=("parallel",),        # batch tiles -> 2 TCs on v7x
                vmem_limit_bytes=int(vmem_limit),
            ),
            cost_estimate=cost,
        )(x_packed, W1, W2)

    try:
        out_packed = run(True)      # constant-index weights: single VMEM buffer
    except Exception:
        # TODO(synk): drop fallback once pl.Buffered(1) on resident-weight specs is
        #             confirmed on the deployed jax build.
        out_packed = run(False)

    if b_pad != b_rows:
        out_packed = out_packed[:b_rows]
    out = out_packed.reshape(b_f, fsl // f)               # pure-metadata un-pack
    return out if b_f == B else out[:B]


def butterfly_blockdiag_forward(x, w1_bfly, w2_bfly):
    """Convenience wrapper matching BlockdiagButterflyMultiply.forward (2-D x).
    Prefer packing once with pack_butterfly_weights() and calling *_packed."""
    W1, W2, f = pack_butterfly_weights(w1_bfly, w2_bfly, x_dtype=x.dtype)
    return butterfly_blockdiag_forward_packed(x, W1, W2, f)


def butterfly_blockdiag_forward_ref(x, w1_bfly, w2_bfly):
    """Pure-JAX reference mirroring the torch forward, for verification."""
    B, n = x.shape
    k, q, p = w1_bfly.shape
    l, s, r = w2_bfly.shape
    x_kbp = jnp.transpose(x.reshape(B, k, p), (1, 0, 2))                 # (k, B, p)
    out1 = jnp.einsum("kbp,kqp->kbq", x_kbp, w1_bfly)                    # (k, B, q)
    out1 = jnp.transpose(out1, (1, 0, 2)).reshape(B, r, l)               # (B, r, l)
    out1 = jnp.transpose(out1, (2, 0, 1))                                # (l, B, r)
    out2 = jnp.einsum("lbr,lsr->lbs", out1, w2_bfly)                     # (l, B, s)
    return jnp.transpose(out2, (1, 2, 0)).reshape(B, s * l)


if __name__ == "__main__":
    # Module hyperparameters (small, consistent with ButterflyBlockDiagLayer(n, q, p, s, r)).
    n, q, p, s, r = 32, 4, 4, 4, 4
    k = n // p                       # 8
    l = n * q // (p * r)             # 8
    batch = 32

    key = jax.random.PRNGKey(0)
    kx, k1, k2 = jax.random.split(key, 3)
    x = jax.random.normal(kx, (batch, n), dtype=jnp.float32)
    # Parameter shapes match torch.randn(k, q, p) / torch.randn(l, s, r).
    w1_bfly = jax.random.normal(k1, (k, q, p), dtype=jnp.float32)
    w2_bfly = jax.random.normal(k2, (l, s, r), dtype=jnp.float32)

    # Pack once (hoisted out of the per-call forward), then run the kernel.
    W1, W2, f = pack_butterfly_weights(w1_bfly, w2_bfly, x_dtype=x.dtype)
    out = jax.block_until_ready(butterfly_blockdiag_forward_packed(x, W1, W2, f))
    ref = jax.block_until_ready(butterfly_blockdiag_forward_ref(x, w1_bfly, w2_bfly))
    assert out.shape == (batch, s * l), out.shape
    assert jnp.allclose(out, ref, atol=1e-4, rtol=1e-4), float(jnp.max(jnp.abs(out - ref)))

    # Ragged batch exercises the (minimal) pad / tail-trim path.
    xr = x[:13]
    out_r = jax.block_until_ready(butterfly_blockdiag_forward(xr, w1_bfly, w2_bfly))
    ref_r = butterfly_blockdiag_forward_ref(xr, w1_bfly, w2_bfly)
    assert out_r.shape == (13, s * l), out_r.shape
    assert jnp.allclose(out_r, ref_r, atol=1e-4, rtol=1e-4), float(jnp.max(jnp.abs(out_r - ref_r)))

    print("KERNEL_OK")
</pallas_src>

<mosaic_0001>
module attributes {stable_mosaic.version = 11 : i64} {
  func.func @_fused_butterfly_kernel(%arg0: i32, %arg1: memref<8x128xf32, #tpu.memory_space<vmem>>, %arg2: memref<128x128xf32, #tpu.memory_space<vmem>>, %arg3: memref<128x128xf32, #tpu.memory_space<vmem>>, %arg4: memref<8x128xf32, #tpu.memory_space<vmem>>) attributes {dimension_semantics = [#tpu.dimension_semantics<parallel>], iteration_bounds = array<i64: 1>, scalar_prefetch = 0 : i64, scratch_operands = 0 : i64, tpu.core_type = #tpu.core_type<tc>, window_params = [{transform_indices = @transform_0, window_bounds = array<i64: 8, 128>}, {pipeline_mode = #tpu.pipeline_mode<synchronous>, transform_indices = @transform_1, window_bounds = array<i64: 128, 128>}, {pipeline_mode = #tpu.pipeline_mode<synchronous>, transform_indices = @transform_2, window_bounds = array<i64: 128, 128>}, {transform_indices = @transform_3, window_bounds = array<i64: 8, 128>}]} {
    %c0 = arith.constant 0 : index
    %c0_0 = arith.constant 0 : index
    %0 = vector.load %arg1[%c0, %c0_0] : memref<8x128xf32, #tpu.memory_space<vmem>>, vector<8x128xf32>
    %c0_1 = arith.constant 0 : index
    %c0_2 = arith.constant 0 : index
    %1 = vector.load %arg2[%c0_1, %c0_2] : memref<128x128xf32, #tpu.memory_space<vmem>>, vector<128x128xf32>
    %cst = arith.constant dense<0.000000e+00> : vector<8x128xf32>
    %2 = tpu.matmul %0, %1, %cst {dimension_numbers = #tpu.dot_dimension_numbers<[1], [0], [0], [1], [0, 0, 1, 1], [], []>} : vector<8x128xf32>, vector<128x128xf32>, vector<8x128xf32> -> vector<8x128xf32>
    %c0_3 = arith.constant 0 : index
    %c0_4 = arith.constant 0 : index
    %3 = vector.load %arg3[%c0_3, %c0_4] : memref<128x128xf32, #tpu.memory_space<vmem>>, vector<128x128xf32>
    %cst_5 = arith.constant dense<0.000000e+00> : vector<8x128xf32>
    %4 = tpu.matmul %2, %3, %cst_5 {dimension_numbers = #tpu.dot_dimension_numbers<[1], [0], [0], [1], [0, 0, 1, 1], [], []>} : vector<8x128xf32>, vector<128x128xf32>, vector<8x128xf32> -> vector<8x128xf32>
    %c0_6 = arith.constant 0 : index
    %c0_7 = arith.constant 0 : index
    %5 = vector.load %arg4[%c0_6, %c0_7] : memref<8x128xf32, #tpu.memory_space<vmem>>, vector<8x128xf32>
    tpu.vector_store %arg4[%c0_6, %c0_7], %4 {strides = array<i32>} : memref<8x128xf32, #tpu.memory_space<vmem>>, vector<8x128xf32>,
    return
  }
  func.func @transform_0(%arg0: i32) -> (i32, i32) {
    %c0_i32 = arith.constant 0 : i32
    %c0_i32_0 = arith.constant 0 : i32
    return %arg0, %c0_i32 : i32, i32
  }
  func.func @transform_1(%arg0: i32) -> (i32, i32) {
    %c0_i32 = arith.constant 0 : i32
    %c0_i32_0 = arith.constant 0 : i32
    %c0_i32_1 = arith.constant 0 : i32
    return %c0_i32, %c0_i32_0 : i32, i32
  }
  func.func @transform_2(%arg0: i32) -> (i32, i32) {
    %c0_i32 = arith.constant 0 : i32
    %c0_i32_0 = arith.constant 0 : i32
    %c0_i32_1 = arith.constant 0 : i32
    return %c0_i32, %c0_i32_0 : i32, i32
  }
  func.func @transform_3(%arg0: i32) -> (i32, i32) {
    %c0_i32 = arith.constant 0 : i32
    %c0_i32_0 = arith.constant 0 : i32
    return %arg0, %c0_i32 : i32, i32
  }
}

module attributes {stable_mosaic.version = 11 : i64} {
  func.func @_fused_butterfly_kernel(%arg0: i32, %arg1: memref<8x128xf32, #tpu.memory_space<vmem>>, %arg2: memref<128x128xf32, #tpu.memory_space<vmem>>, %arg3: memref<128x128xf32, #tpu.memory_space<vmem>>, %arg4: memref<8x128xf32, #tpu.memory_space<vmem>>) attributes {dimension_semantics = [#tpu.dimension_semantics<parallel>], iteration_bounds = array<i64: 1>, scalar_prefetch = 0 : i64, scratch_operands = 0 : i64, tpu.core_type = #tpu.core_type<tc>, window_params = [{transform_indices = @transform_0, window_bounds = array<i64: 8, 128>}, {pipeline_mode = #tpu.pipeline_mode<synchronous>, transform_indices = @transform_1, window_bounds = array<i64: 128, 128>}, {pipeline_mode = #tpu.pipeline_mode<synchronous>, transform_indices = @transform_2, window_bounds = array<i64: 128, 128>}, {transform_indices = @transform_3, window_bounds = array<i64: 8, 128>}]} {
    %c0 = arith.constant 0 : index
    %c0_0 = arith.constant 0 : index
    %0 = vector.load %arg1[%c0, %c0_0] : memref<8x128xf32, #tpu.memory_space<vmem>>, vector<8x128xf32>
    %c0_1 = arith.constant 0 : index
    %c0_2 = arith.constant 0 : index
    %1 = vector.load %arg2[%c0_1, %c0_2] : memref<128x128xf32, #tpu.memory_space<vmem>>, vector<128x128xf32>
    %cst = arith.constant dense<0.000000e+00> : vector<8x128xf32>
    %2 = tpu.matmul %0, %1, %cst {dimension_numbers = #tpu.dot_dimension_numbers<[1], [0], [0], [1], [0, 0, 1, 1], [], []>} : vector<8x128xf32>, vector<128x128xf32>, vector<8x128xf32> -> vector<8x128xf32>
    %c0_3 = arith.constant 0 : index
    %c0_4 = arith.constant 0 : index
    %3 = vector.load %arg3[%c0_3, %c0_4] : memref<128x128xf32, #tpu.memory_space<vmem>>, vector<128x128xf32>
    %cst_5 = arith.constant dense<0.000000e+00> : vector<8x128xf32>
    %4 = tpu.matmul %2, %3, %cst_5 {dimension_numbers = #tpu.dot_dimension_numbers<[1], [0], [0], [1], [0, 0, 1, 1], [], []>} : vector<8x128xf32>, vector<128x128xf32>, vector<8x128xf32> -> vector<8x128xf32>
    %c0_6 = arith.constant 0 : index
    %c0_7 = arith.constant 0 : index
    %5 = vector.load %arg4[%c0_6, %c0_7] : memref<8x128xf32, #tpu.memory_space<vmem>>, vector<8x128xf32>
    tpu.vector_store %arg4[%c0_6, %c0_7], %4 {strides = array<i32>} : memref<8x128xf32, #tpu.memory_space<vmem>>, vector<8x128xf32>,
    return
  }
  func.func @transform_0(%arg0: i32) -> (i32, i32) {
    %c0_i32 = arith.constant 0 : i32
    %c0_i32_0 = arith.constant 0 : i32
    return %arg0, %c0_i32 : i32, i32
  }
  func.func @transform_1(%arg0: i32) -> (i32, i32) {
    %c0_i32 = arith.constant 0 : i32
    %c0_i32_0 = arith.constant 0 : i32
    %c0_i32_1 = arith.constant 0 : i32
    return %c0_i32, %c0_i32_0 : i32, i32
  }
  func.func @transform_2(%arg0: i32) -> (i32, i32) {
    %c0_i32 = arith.constant 0 : i32
    %c0_i32_0 = arith.constant 0 : i32
    %c0_i32_1 = arith.constant 0 : i32
    return %c0_i32, %c0_i32_0 : i32, i32
  }
  func.func @transform_3(%arg0: i32) -> (i32, i32) {
    %c0_i32 = arith.constant 0 : i32
    %c0_i32_0 = arith.constant 0 : i32
    return %arg0, %c0_i32 : i32, i32
  }
}

</mosaic_0001>

<bundles_post_ra>
// kernel: tpu_custom_call.1
= control target key start
LH: loop header
LB: loop body
LE: loop exit
PB: predicated region body
PF: predicated region fallthrough
CT: control target
= control target key end

     0   :  { %8 = vsyncpa [#allocation3], 0  ;;  %s598_s0 = inlined_call_operand.hbm [shape: f32[8,128], index: 0, kind: input, shape index: {}]   ;;  %s599_s1 = inlined_call_operand.hbm [shape: f32[128,128], index: 1, kind: input, shape index: {}]   ;;  %s600_s2 = inlined_call_operand.hbm [shape: f32[128,128], index: 2, kind: input, shape index: {}]   ;;  %s601_s3 = inlined_call_operand.hbm [shape: f32[8,128], index: 3, kind: output, shape index: {}]  }
   0x1   :  { %9 = vsyncpa [#allocation6], 0 }
   0x2   :  { %10 = vsyncpa [#allocation4], 0  ;;  %s499_s12 = smov [#allocation5]   ;;  %s405_s16 = scalar_lea.hbm %s599_s1, 2048 }
   0x3   :  { %s26_s13 = sshll.u32 %s499_s12, 4  ;;  %p406_p0 = scmp.ne.s32.totalorder %s599_s1, %s405_s16  ;;  %s27_s13 = int_to_ptr.vmem [resolvable:$true] %s26_s13 }
   0x4   :  { %p409_p1 = scmp.lt.u32.totalorder %s405_s16, %s599_s1 }
   0x6   :  { %p411_p2 = pnand %p409_p1, %p406_p0 }
   0x8   :  { %414 = shalt.err (!%p411_p2)
}
   0x9   :  { %s415_s21 = scalar_lea.vmem %s27_s13, 2048  ;;  %p420_p4 = scmp.lt.s32.totalorder %s27_s13, %s27_s13 }
   0xa   :  { %p416_p3 = scmp.ne.s32.totalorder %s27_s13, %s415_s21  ;;  %p421_p5 = scmp.lt.s32.totalorder %s415_s21, %s415_s21 }
   0xc   :  { %p422_p6 = por %p421_p5, %p420_p4 }
   0xe   :  { %p423_p7 = pnand %p422_p6, %p416_p3 }
  0x10   :  { %426 = shalt.err (!%p423_p7)
}
  0x11   :  { %s500_s22 = smov 128   ;;  %s501_s23 = smov 8  }
  0x12   :  { %32 = dma.hbm_to_vmem [thread:$0]  %s599_s1, 2048, %s27_s13, [#allocation6], %s500_s22, %s500_s22, %s501_s23  }
  0x13   :  { %s502_s26 = smov [#allocation2]   ;;  %s503_s28 = smov [#allocation7]  }
  0x14   :  { %s17_s27 = sshll.u32 %s502_s26, 4  ;;  %s38_s29 = sshll.u32 %s503_s28, 4  ;;  %s18_s27 = int_to_ptr.vmem [resolvable:$true] %s17_s27  ;;  %s39_s29 = int_to_ptr.vmem [resolvable:$true] %s38_s29 }
  0x15   :  { %s427_s5 = scalar_lea.hbm %s598_s0, 128 }
  0x16   :  { %p428_p8 = scmp.ne.s32.totalorder %s598_s0, %s427_s5  ;;  %p431_p9 = scmp.lt.u32.totalorder %s427_s5, %s598_s0 }
  0x18   :  { %p433_p10 = pnand %p431_p9, %p428_p8 }
  0x1a   :  { %436 = shalt.err (!%p433_p10)
}
  0x1b   :  { %s437_s1 = scalar_lea.vmem %s18_s27, 128  ;;  %p442_p12 = scmp.lt.s32.totalorder %s18_s27, %s18_s27 }
  0x1c   :  { %p438_p11 = scmp.ne.s32.totalorder %s18_s27, %s437_s1  ;;  %p443_p13 = scmp.lt.s32.totalorder %s437_s1, %s437_s1 }
  0x1e   :  { %p444_p0 = por %p443_p13, %p442_p12 }
  0x20   :  { %p445_p1 = pnand %p444_p0, %p438_p11 }
  0x22   :  { %448 = shalt.err (!%p445_p1)
}
  0x23   :  { %20 = dma.hbm_to_vmem [thread:$0]  %s598_s0, 128, %s18_s27, [#allocation3]  }
  0x24   :  { %s449_s14 = scalar_lea.hbm %s600_s2, 2048 }
  0x25   :  { %p450_p2 = scmp.ne.s32.totalorder %s600_s2, %s449_s14  ;;  %p453_p3 = scmp.lt.u32.totalorder %s449_s14, %s600_s2 }
  0x27   :  { %p455_p4 = pnand %p453_p3, %p450_p2 }
  0x29   :  { %458 = shalt.err (!%p455_p4)
}
  0x2a   :  { %s459_s19 = scalar_lea.vmem %s39_s29, 2048  ;;  %p464_p6 = scmp.lt.s32.totalorder %s39_s29, %s39_s29 }
  0x2b   :  { %p460_p5 = scmp.ne.s32.totalorder %s39_s29, %s459_s19  ;;  %p465_p7 = scmp.lt.s32.totalorder %s459_s19, %s459_s19 }
  0x2d   :  { %p466_p8 = por %p465_p7, %p464_p6 }
  0x2f   :  { %p467_p9 = pnand %p466_p8, %p460_p5 }
  0x31   :  { %470 = shalt.err (!%p467_p9)
}
  0x32   :  { %44 = dma.hbm_to_vmem [thread:$0]  %s600_s2, 2048, %s39_s29, [#allocation6], %s500_s22, %s500_s22, %s501_s23  }
  0x33   :  { %493 = dma.done.wait [#allocation3], 128  }
  0x34   :  { %494 = vsyncadd [#allocation3], 4294967168 }
  0x35   :  { %495 = dma.done.wait [#allocation6], 4096  }
  0x36   :  { %496 = vsyncadd [#allocation6], 4294963200  ;;  %v504_v0 = vmov 0.0|0.0   ;;  %vm505_vm0 = vmmov 0   ;;  %v506_v1 = vmov 0.0   ;;  %v55_v2 = vld [vmem:[#allocation5] sm:$0xff] }
  0x37   :  { %348 = vmatprep.subr.bf16.mxu0 %v504_v0  ;;  %310 = vmatprep.mubr.msk.f32.mxu0 %vm505_vm0, %v506_v1  ;;  %v56_v3 = vld [vmem:[#allocation5 + $0x8] sm:$0xff]  ;;  %v57_v4 = vld [vmem:[#allocation5 + $0x10] sm:$0xff]  ;;  %v58_v6 = vld [vmem:[#allocation5 + $0x18] sm:$0xff]  ;;  %s507_s2 = smov [#allocation8]  }
  0x38   :  { %372 = vmatprep.subr.bf16.mxu1 %v504_v0  ;;  %345 = vmatprep.mubr.msk.f32.mxu1 %vm505_vm0, %v506_v1  ;;  %v349_v5 = vpack.c.bf16 %v56_v3, %v55_v2  ;;  %v352_v7 = vpack.c.bf16 %v58_v6, %v57_v4  ;;  %v59_v8 = vld [vmem:[#allocation5 + $0x20] sm:$0xff]  ;;  %v60_v9 = vld [vmem:[#allocation5 + $0x28] sm:$0xff]  ;;  %v143_v12 = vld [vmem:[#allocation7 + $0x10] sm:$0xff]  ;;  %s234_s21 = sshll.u32 %s507_s2, 4  ;;  %s235_s21 = int_to_ptr.vmem [resolvable:$true] %s234_s21 }
  0x39   :  { %v141_v10 = vld [vmem:[#allocation7] sm:$0xff]  ;;  %v142_v11 = vld [vmem:[#allocation7 + $0x8] sm:$0xff]  ;;  %v144_v13 = vld [vmem:[#allocation7 + $0x18] sm:$0xff]  ;;  %v355_v14 = vpack.c.bf16 %v60_v9, %v59_v8  ;;  %s471_s22 = scalar_lea.vmem %s235_s21, 128  ;;  %p476_p11 = scmp.lt.s32.totalorder %s235_s21, %s235_s21 }
  0x3a   :  { %350 = vmatpush3.bf16.msra.mxu0 %v349_v5  ;;  %v373_v15 = vpack.c.bf16 %v142_v11, %v141_v10  ;;  %v61_v16 = vld [vmem:[#allocation5 + $0x30] sm:$0xff]  ;;  %v62_v17 = vld [vmem:[#allocation5 + $0x38] sm:$0xff]  ;;  %v376_v18 = vpack.c.bf16 %v144_v13, %v143_v12  ;;  %v145_v19 = vld [vmem:[#allocation7 + $0x20] sm:$0xff]  ;;  %p472_p10 = scmp.ne.s32.totalorder %s235_s21, %s471_s22  ;;  %p477_p12 = scmp.lt.s32.totalorder %s471_s22, %s471_s22 }
  0x3b   :  { %351 = vmatprep.subr.bf16.mxu0 %v504_v0  ;;  %v146_v20 = vld [vmem:[#allocation7 + $0x28] sm:$0xff]  ;;  %v358_v21 = vpack.c.bf16 %v62_v17, %v61_v16  ;;  %v63_v22 = vld [vmem:[#allocation5 + $0x40] sm:$0xff]  ;;  %v147_v25 = vld [vmem:[#allocation7 + $0x30] sm:$0xff] }
  0x3c   :  { %374 = vmatpush3.bf16.msra.mxu1 %v373_v15  ;;  %v64_v23 = vld [vmem:[#allocation5 + $0x48] sm:$0xff]  ;;  %v379_v24 = vpack.c.bf16 %v146_v20, %v145_v19  ;;  %v148_v26 = vld [vmem:[#allocation7 + $0x38] sm:$0xff]  ;;  %v65_v28 = vld [vmem:[#allocation5 + $0x50] sm:$0xff]  ;;  %p478_p13 = por %p477_p12, %p476_p11 }
  0x3d   :  { %375 = vmatprep.subr.bf16.mxu1 %v504_v0  ;;  %v361_v27 = vpack.c.bf16 %v64_v23, %v63_v22  ;;  %v66_v29 = vld [vmem:[#allocation5 + $0x58] sm:$0xff]  ;;  %v382_v30 = vpack.c.bf16 %v148_v26, %v147_v25  ;;  %v149_v31 = vld [vmem:[#allocation7 + $0x40] sm:$0xff]  ;;  %v150_v32 = vld [vmem:[#allocation7 + $0x48] sm:$0xff] }
  0x3e   :  { %353 = vmatpush3.bf16.msra.mxu0 %v352_v7  ;;  %v364_v33 = vpack.c.bf16 %v66_v29, %v65_v28  ;;  %v67_v34 = vld [vmem:[#allocation5 + $0x60] sm:$0xff]  ;;  %v68_v35 = vld [vmem:[#allocation5 + $0x68] sm:$0xff]  ;;  %v385_v36 = vpack.c.bf16 %v150_v32, %v149_v31  ;;  %v151_v37 = vld [vmem:[#allocation7 + $0x50] sm:$0xff]  ;;  %p479_p0 = pnand %p478_p13, %p472_p10 }
  0x3f   :  { %354 = vmatprep.subr.bf16.mxu0 %v504_v0  ;;  %v152_v38 = vld [vmem:[#allocation7 + $0x58] sm:$0xff]  ;;  %v367_v39 = vpack.c.bf16 %v68_v35, %v67_v34  ;;  %v69_v40 = vld [vmem:[#allocation5 + $0x70] sm:$0xff]  ;;  %v153_v43 = vld [vmem:[#allocation7 + $0x60] sm:$0xff] }
  0x40   :  { %377 = vmatpush3.bf16.msra.mxu1 %v376_v18  ;;  %v70_v41 = vld [vmem:[#allocation5 + $0x78] sm:$0xff]  ;;  %v388_v42 = vpack.c.bf16 %v152_v38, %v151_v37  ;;  %v154_v44 = vld [vmem:[#allocation7 + $0x68] sm:$0xff]  ;;  %v155_v47 = vld [vmem:[#allocation7 + $0x70] sm:$0xff] }
  0x41   :  { %378 = vmatprep.subr.bf16.mxu1 %v504_v0  ;;  %v370_v45 = vpack.c.bf16 %v70_v41, %v69_v40  ;;  %v391_v46 = vpack.c.bf16 %v154_v44, %v153_v43  ;;  %v156_v48 = vld [vmem:[#allocation7 + $0x78] sm:$0xff] }
  0x42   :  { %356 = vmatpush3.bf16.msra.mxu0 %v355_v14  ;;  %v54_v49 = vld [vmem:[#allocation2] sm:$0xff]  ;;  %v394_v50 = vpack.c.bf16 %v156_v48, %v155_v47 }
  0x43   :  { %357 = vmatprep.subr.bf16.mxu0 %v504_v0 }
  0x44   :  { %380 = vmatpush3.bf16.msra.mxu1 %v379_v24 }
  0x45   :  { %381 = vmatprep.subr.bf16.mxu1 %v504_v0 }
  0x46   :  { %359 = vmatpush3.bf16.msra.mxu0 %v358_v21 }
  0x47   :  { %360 = vmatprep.subr.bf16.mxu0 %v504_v0 }
  0x48   :  { %383 = vmatpush3.bf16.msra.mxu1 %v382_v30 }
  0x49   :  { %384 = vmatprep.subr.bf16.mxu1 %v504_v0 }
  0x4a   :  { %362 = vmatpush3.bf16.msra.mxu0 %v361_v27 }
  0x4b   :  { %363 = vmatprep.subr.bf16.mxu0 %v504_v0 }
  0x4c   :  { %386 = vmatpush3.bf16.msra.mxu1 %v385_v36 }
  0x4d   :  { %387 = vmatprep.subr.bf16.mxu1 %v504_v0 }
  0x4e   :  { %365 = vmatpush3.bf16.msra.mxu0 %v364_v33 }
  0x4f   :  { %366 = vmatprep.subr.bf16.mxu0 %v504_v0 }
  0x50   :  { %389 = vmatpush3.bf16.msra.mxu1 %v388_v42 }
  0x51   :  { %390 = vmatprep.subr.bf16.mxu1 %v504_v0 }
  0x52   :  { %368 = vmatpush3.bf16.msra.mxu0 %v367_v39 }
  0x53   :  { %369 = vmatprep.subr.bf16.mxu0 %v504_v0 }
  0x54   :  { %392 = vmatpush3.bf16.msra.mxu1 %v391_v46 }
  0x55   :  { %393 = vmatprep.subr.bf16.mxu1 %v504_v0 }
  0x56   :  { %371 = vmatpush3.bf16.msra.mxu0 %v370_v45 }
  0x58   :  { %395 = vmatpush3.bf16.msra.mxu1 %v394_v50 }
  0x59   :  { %311 = vmatmul.mubr.f32.vlgmr.msra.gmra.mrb[0].mxu0 %v54_v49 }
 0x12c   :  { %v137_v51 = vpop.f32.mrb[0].mxu0 }
 0x12d   :  { %v312_v52 = vpop.f32.mrb[1].mxu0  ;;  %346 = vmatmul.mubr.f32.vlgmr.msra.gmra.mrb[0].mxu1 %v137_v51 }
 0x200   :  { %v223_v53 = vpop.f32.mrb[0].mxu1 }
 0x201   :  { %227 = vst [vmem:[#allocation8] sm:$0xff] %v223_v53  ;;  %v347_v54 = vpop.f32.mrb[1].mxu1 }
 0x202   :  { %482 = shalt.err (!%p479_p0)
}
 0x203   :  { %s483_s25 = scalar_lea.hbm %s601_s3, 128 }
 0x204   :  { %p484_p1 = scmp.ne.s32.totalorder %s601_s3, %s483_s25  ;;  %p487_p2 = scmp.lt.u32.totalorder %s483_s25, %s601_s3 }
 0x206   :  { %p489_p3 = pnand %p487_p2, %p484_p1 }
 0x208   :  { %492 = shalt.err (!%p489_p3)
}
 0x209   :  { %237 = dma.vmem_to_hbm [thread:$0]  %s235_s21, 128, %s601_s3, [#allocation4]  }
 0x20a   :  { %497 = dma.done.wait [#allocation4], 128  }
 0x20b   :  { %498 = vsyncadd [#allocation4], 4294967168 }
 0x20c   :  { %241 = vsyncpa [#allocation3], 1 }
 0x20d   :  { %242 = vsyncpa [#allocation6], 1 }
 0x20e   :  { %243 = vsyncpa [#allocation4], 1 }

// kernel: tpu_custom_call.1
= control target key start
LH: loop header
LB: loop body
LE: loop exit
PB: predicated region body
PF: predicated region fallthrough
CT: control target
= control target key end

     0   :  { %8 = vsyncpa [#allocation3], 0  ;;  %s598_s0 = inlined_call_operand.hbm [shape: f32[8,128], index: 0, kind: input, shape index: {}]   ;;  %s599_s1 = inlined_call_operand.hbm [shape: f32[128,128], index: 1, kind: input, shape index: {}]   ;;  %s600_s2 = inlined_call_operand.hbm [shape: f32[128,128], index: 2, kind: input, shape index: {}]   ;;  %s601_s3 = inlined_call_operand.hbm [shape: f32[8,128], index: 3, kind: output, shape index: {}]  }
   0x1   :  { %9 = vsyncpa [#allocation6], 0 }
   0x2   :  { %10 = vsyncpa [#allocation4], 0  ;;  %s499_s12 = smov [#allocation5]   ;;  %s405_s16 = scalar_lea.hbm %s599_s1, 2048 }
   0x3   :  { %s26_s13 = sshll.u32 %s499_s12, 4  ;;  %p406_p0 = scmp.ne.s32.totalorder %s599_s1, %s405_s16  ;;  %s27_s13 = int_to_ptr.vmem [resolvable:$true] %s26_s13 }
   0x4   :  { %p409_p1 = scmp.lt.u32.totalorder %s405_s16, %s599_s1 }
   0x6   :  { %p411_p2 = pnand %p409_p1, %p406_p0 }
   0x8   :  { %414 = shalt.err (!%p411_p2)
}
   0x9   :  { %s415_s21 = scalar_lea.vmem %s27_s13, 2048  ;;  %p420_p4 = scmp.lt.s32.totalorder %s27_s13, %s27_s13 }
   0xa   :  { %p416_p3 = scmp.ne.s32.totalorder %s27_s13, %s415_s21  ;;  %p421_p5 = scmp.lt.s32.totalorder %s415_s21, %s415_s21 }
   0xc   :  { %p422_p6 = por %p421_p5, %p420_p4 }
   0xe   :  { %p423_p7 = pnand %p422_p6, %p416_p3 }
  0x10   :  { %426 = shalt.err (!%p423_p7)
}
  0x11   :  { %s500_s22 = smov 128   ;;  %s501_s23 = smov 8  }
  0x12   :  { %32 = dma.hbm_to_vmem [thread:$0]  %s599_s1, 2048, %s27_s13, [#allocation6], %s500_s22, %s500_s22, %s501_s23  }
  0x13   :  { %s502_s26 = smov [#allocation2]   ;;  %s503_s28 = smov [#allocation7]  }
  0x14   :  { %s17_s27 = sshll.u32 %s502_s26, 4  ;;  %s38_s29 = sshll.u32 %s503_s28, 4  ;;  %s18_s27 = int_to_ptr.vmem [resolvable:$true] %s17_s27  ;;  %s39_s29 = int_to_ptr.vmem [resolvable:$true] %s38_s29 }
  0x15   :  { %s427_s5 = scalar_lea.hbm %s598_s0, 128 }
  0x16   :  { %p428_p8 = scmp.ne.s32.totalorder %s598_s0, %s427_s5  ;;  %p431_p9 = scmp.lt.u32.totalorder %s427_s5, %s598_s0 }
  0x18   :  { %p433_p10 = pnand %p431_p9, %p428_p8 }
  0x1a   :  { %436 = shalt.err (!%p433_p10)
}
  0x1b   :  { %s437_s1 = scalar_lea.vmem %s18_s27, 128  ;;  %p442_p12 = scmp.lt.s32.totalorder %s18_s27, %s18_s27 }
  0x1c   :  { %p438_p11 = scmp.ne.s32.totalorder %s18_s27, %s437_s1  ;;  %p443_p13 = scmp.lt.s32.totalorder %s437_s1, %s437_s1 }
  0x1e   :  { %p444_p0 = por %p443_p13, %p442_p12 }
  0x20   :  { %p445_p1 = pnand %p444_p0, %p438_p11 }
  0x22   :  { %448 = shalt.err (!%p445_p1)
}
  0x23   :  { %20 = dma.hbm_to_vmem [thread:$0]  %s598_s0, 128, %s18_s27, [#allocation3]  }
  0x24   :  { %s449_s14 = scalar_lea.hbm %s600_s2, 2048 }
  0x25   :  { %p450_p2 = scmp.ne.s32.totalorder %s600_s2, %s449_s14  ;;  %p453_p3 = scmp.lt.u32.totalorder %s449_s14, %s600_s2 }
  0x27   :  { %p455_p4 = pnand %p453_p3, %p450_p2 }
  0x29   :  { %458 = shalt.err (!%p455_p4)
}
  0x2a   :  { %s459_s19 = scalar_lea.vmem %s39_s29, 2048  ;;  %p464_p6 = scmp.lt.s32.totalorder %s39_s29, %s39_s29 }
  0x2b   :  { %p460_p5 = scmp.ne.s32.totalorder %s39_s29, %s459_s19  ;;  %p465_p7 = scmp.lt.s32.totalorder %s459_s19, %s459_s19 }
  0x2d   :  { %p466_p8 = por %p465_p7, %p464_p6 }
  0x2f   :  { %p467_p9 = pnand %p466_p8, %p460_p5 }
  0x31   :  { %470 = shalt.err (!%p467_p9)
}
  0x32   :  { %44 = dma.hbm_to_vmem [thread:$0]  %s600_s2, 2048, %s39_s29, [#allocation6], %s500_s22, %s500_s22, %s501_s23  }
  0x33   :  { %493 = dma.done.wait [#allocation3], 128  }
  0x34   :  { %494 = vsyncadd [#allocation3], 4294967168 }
  0x35   :  { %495 = dma.done.wait [#allocation6], 4096  }
  0x36   :  { %496 = vsyncadd [#allocation6], 4294963200  ;;  %v504_v0 = vmov 0.0|0.0   ;;  %vm505_vm0 = vmmov 0   ;;  %v506_v1 = vmov 0.0   ;;  %v55_v2 = vld [vmem:[#allocation5] sm:$0xff] }
  0x37   :  { %348 = vmatprep.subr.bf16.mxu0 %v504_v0  ;;  %310 = vmatprep.mubr.msk.f32.mxu0 %vm505_vm0, %v506_v1  ;;  %v56_v3 = vld [vmem:[#allocation5 + $0x8] sm:$0xff]  ;;  %v57_v4 = vld [vmem:[#allocation5 + $0x10] sm:$0xff]  ;;  %v58_v6 = vld [vmem:[#allocation5 + $0x18] sm:$0xff]  ;;  %s507_s2 = smov [#allocation8]  }
  0x38   :  { %372 = vmatprep.subr.bf16.mxu1 %v504_v0  ;;  %345 = vmatprep.mubr.msk.f32.mxu1 %vm505_vm0, %v506_v1  ;;  %v349_v5 = vpack.c.bf16 %v56_v3, %v55_v2  ;;  %v352_v7 = vpack.c.bf16 %v58_v6, %v57_v4  ;;  %v59_v8 = vld [vmem:[#allocation5 + $0x20] sm:$0xff]  ;;  %v60_v9 = vld [vmem:[#allocation5 + $0x28] sm:$0xff]  ;;  %v143_v12 = vld [vmem:[#allocation7 + $0x10] sm:$0xff]  ;;  %s234_s21 = sshll.u32 %s507_s2, 4  ;;  %s235_s21 = int_to_ptr.vmem [resolvable:$true] %s234_s21 }
  0x39   :  { %v141_v10 = vld [vmem:[#allocation7] sm:$0xff]  ;;  %v142_v11 = vld [vmem:[#allocation7 + $0x8] sm:$0xff]  ;;  %v144_v13 = vld [vmem:[#allocation7 + $0x18] sm:$0xff]  ;;  %v355_v14 = vpack.c.bf16 %v60_v9, %v59_v8  ;;  %s471_s22 = scalar_lea.vmem %s235_s21, 128  ;;  %p476_p11 = scmp.lt.s32.totalorder %s235_s21, %s235_s21 }
  0x3a   :  { %350 = vmatpush3.bf16.msra.mxu0 %v349_v5  ;;  %v373_v15 = vpack.c.bf16 %v142_v11, %v141_v10  ;;  %v61_v16 = vld [vmem:[#allocation5 + $0x30] sm:$0xff]  ;;  %v62_v17 = vld [vmem:[#allocation5 + $0x38] sm:$0xff]  ;;  %v376_v18 = vpack.c.bf16 %v144_v13, %v143_v12  ;;  %v145_v19 = vld [vmem:[#allocation7 + $0x20] sm:$0xff]  ;;  %p472_p10 = scmp.ne.s32.totalorder %s235_s21, %s471_s22  ;;  %p477_p12 = scmp.lt.s32.totalorder %s471_s22, %s471_s22 }
  0x3b   :  { %351 = vmatprep.subr.bf16.mxu0 %v504_v0  ;;  %v146_v20 = vld [vmem:[#allocation7 + $0x28] sm:$0xff]  ;;  %v358_v21 = vpack.c.bf16 %v62_v17, %v61_v16  ;;  %v63_v22 = vld [vmem:[#allocation5 + $0x40] sm:$0xff]  ;;  %v147_v25 = vld [vmem:[#allocation7 + $0x30] sm:$0xff] }
  0x3c   :  { %374 = vmatpush3.bf16.msra.mxu1 %v373_v15  ;;  %v64_v23 = vld [vmem:[#allocation5 + $0x48] sm:$0xff]  ;;  %v379_v24 = vpack.c.bf16 %v146_v20, %v145_v19  ;;  %v148_v26 = vld [vmem:[#allocation7 + $0x38] sm:$0xff]  ;;  %v65_v28 = vld [vmem:[#allocation5 + $0x50] sm:$0xff]  ;;  %p478_p13 = por %p477_p12, %p476_p11 }
  0x3d   :  { %375 = vmatprep.subr.bf16.mxu1 %v504_v0  ;;  %v361_v27 = vpack.c.bf16 %v64_v23, %v63_v22  ;;  %v66_v29 = vld [vmem:[#allocation5 + $0x58] sm:$0xff]  ;;  %v382_v30 = vpack.c.bf16 %v148_v26, %v147_v25  ;;  %v149_v31 = vld [vmem:[#allocation7 + $0x40] sm:$0xff]  ;;  %v150_v32 = vld [vmem:[#allocation7 + $0x48] sm:$0xff] }
  0x3e   :  { %353 = vmatpush3.bf16.msra.mxu0 %v352_v7  ;;  %v364_v33 = vpack.c.bf16 %v66_v29, %v65_v28  ;;  %v67_v34 = vld [vmem:[#allocation5 + $0x60] sm:$0xff]  ;;  %v68_v35 = vld [vmem:[#allocation5 + $0x68] sm:$0xff]  ;;  %v385_v36 = vpack.c.bf16 %v150_v32, %v149_v31  ;;  %v151_v37 = vld [vmem:[#allocation7 + $0x50] sm:$0xff]  ;;  %p479_p0 = pnand %p478_p13, %p472_p10 }
  0x3f   :  { %354 = vmatprep.subr.bf16.mxu0 %v504_v0  ;;  %v152_v38 = vld [vmem:[#allocation7 + $0x58] sm:$0xff]  ;;  %v367_v39 = vpack.c.bf16 %v68_v35, %v67_v34  ;;  %v69_v40 = vld [vmem:[#allocation5 + $0x70] sm:$0xff]  ;;  %v153_v43 = vld [vmem:[#allocation7 + $0x60] sm:$0xff] }
  0x40   :  { %377 = vmatpush3.bf16.msra.mxu1 %v376_v18  ;;  %v70_v41 = vld [vmem:[#allocation5 + $0x78] sm:$0xff]  ;;  %v388_v42 = vpack.c.bf16 %v152_v38, %v151_v37  ;;  %v154_v44 = vld [vmem:[#allocation7 + $0x68] sm:$0xff]  ;;  %v155_v47 = vld [vmem:[#allocation7 + $0x70] sm:$0xff] }
  0x41   :  { %378 = vmatprep.subr.bf16.mxu1 %v504_v0  ;;  %v370_v45 = vpack.c.bf16 %v70_v41, %v69_v40  ;;  %v391_v46 = vpack.c.bf16 %v154_v44, %v153_v43  ;;  %v156_v48 = vld [vmem:[#allocation7 + $0x78] sm:$0xff] }
  0x42   :  { %356 = vmatpush3.bf16.msra.mxu0 %v355_v14  ;;  %v54_v49 = vld [vmem:[#allocation2] sm:$0xff]  ;;  %v394_v50 = vpack.c.bf16 %v156_v48, %v155_v47 }
  0x43   :  { %357 = vmatprep.subr.bf16.mxu0 %v504_v0 }
  0x44   :  { %380 = vmatpush3.bf16.msra.mxu1 %v379_v24 }
  0x45   :  { %381 = vmatprep.subr.bf16.mxu1 %v504_v0 }
  0x46   :  { %359 = vmatpush3.bf16.msra.mxu0 %v358_v21 }
  0x47   :  { %360 = vmatprep.subr.bf16.mxu0 %v504_v0 }
  0x48   :  { %383 = vmatpush3.bf16.msra.mxu1 %v382_v30 }
  0x49   :  { %384 = vmatprep.subr.bf16.mxu1 %v504_v0 }
  0x4a   :  { %362 = vmatpush3.bf16.msra.mxu0 %v361_v27 }
  0x4b   :  { %363 = vmatprep.subr.bf16.mxu0 %v504_v0 }
  0x4c   :  { %386 = vmatpush3.bf16.msra.mxu1 %v385_v36 }
  0x4d   :  { %387 = vmatprep.subr.bf16.mxu1 %v504_v0 }
  0x4e   :  { %365 = vmatpush3.bf16.msra.mxu0 %v364_v33 }
  0x4f   :  { %366 = vmatprep.subr.bf16.mxu0 %v504_v0 }
  0x50   :  { %389 = vmatpush3.bf16.msra.mxu1 %v388_v42 }
  0x51   :  { %390 = vmatprep.subr.bf16.mxu1 %v504_v0 }
  0x52   :  { %368 = vmatpush3.bf16.msra.mxu0 %v367_v39 }
  0x53   :  { %369 = vmatprep.subr.bf16.mxu0 %v504_v0 }
  0x54   :  { %392 = vmatpush3.bf16.msra.mxu1 %v391_v46 }
  0x55   :  { %393 = vmatprep.subr.bf16.mxu1 %v504_v0 }
  0x56   :  { %371 = vmatpush3.bf16.msra.mxu0 %v370_v45 }
  0x58   :  { %395 = vmatpush3.bf16.msra.mxu1 %v394_v50 }
  0x59   :  { %311 = vmatmul.mubr.f32.vlgmr.msra.gmra.mrb[0].mxu0 %v54_v49 }
 0x12c   :  { %v137_v51 = vpop.f32.mrb[0].mxu0 }
 0x12d   :  { %v312_v52 = vpop.f32.mrb[1].mxu0  ;;  %346 = vmatmul.mubr.f32.vlgmr.msra.gmra.mrb[0].mxu1 %v137_v51 }
 0x200   :  { %v223_v53 = vpop.f32.mrb[0].mxu1 }
 0x201   :  { %227 = vst [vmem:[#allocation8] sm:$0xff] %v223_v53  ;;  %v347_v54 = vpop.f32.mrb[1].mxu1 }
 0x202   :  { %482 = shalt.err (!%p479_p0)
}
 0x203   :  { %s483_s25 = scalar_lea.hbm %s601_s3, 128 }
 0x204   :  { %p484_p1 = scmp.ne.s32.totalorder %s601_s3, %s483_s25  ;;  %p487_p2 = scmp.lt.u32.totalorder %s483_s25, %s601_s3 }
 0x206   :  { %p489_p3 = pnand %p487_p2, %p484_p1 }
 0x208   :  { %492 = shalt.err (!%p489_p3)
}
 0x209   :  { %237 = dma.vmem_to_hbm [thread:$0]  %s235_s21, 128, %s601_s3, [#allocation4]  }
 0x20a   :  { %497 = dma.done.wait [#allocation4], 128  }
 0x20b   :  { %498 = vsyncadd [#allocation4], 4294967168 }
 0x20c   :  { %241 = vsyncpa [#allocation3], 1 }
 0x20d   :  { %242 = vsyncpa [#allocation6], 1 }
 0x20e   :  { %243 = vsyncpa [#allocation4], 1 }

</bundles_post_ra>
